<compile_context>
chip_gen: v7x
topology: tpu7x:2x2x1
jax: 0.10.0
libtpu: 0.0.40
codegen_flags: <defaults>
</compile_context>

<pallas_src>
import functools

import jax
import jax.numpy as jnp
from jax import lax
from jax.experimental import pallas as pl
from jax.experimental.pallas import tpu as pltpu

EPS = 1e-5

# Matmul-operand dtype.  jnp.bfloat16 is the full-rate MXU path on v6e/v7x and
# halves tap/im2col bytes, but operand rounding relaxes accuracy to ~1e-2;
# kept float32 here so the strict 1e-4 reference tolerance below holds.
MATMUL_DTYPE = jnp.float32


def bottleneck_kernel(x_ref, mask_ref, w1_ref, b1_ref, w2_ref, b2_ref,
                      w3_ref, b3_ref, o_ref, *, W, matmul_dtype):
    # x_ref block: (1, Cin, L) with L = images_per_step * H*W on the lane axis.
    # ---- conv1 (1x1, BN scale folded into w1) + bias + relu ----
    t1 = jnp.dot(w1_ref[...], x_ref[0].astype(matmul_dtype),
                 preferred_element_type=jnp.float32)
    t1 = jnp.maximum(t1 + b1_ref[...], 0.0)                         # (P, L) f32
    L = t1.shape[1]

    # ---- conv2 (3x3, stride 1, pad 1) ----
    # Taps are lane-rolls of t1 (XLU slot) times precomputed border masks
    # (one VPU mul each).  Accumulate three K=3P dots (one per kh row) instead
    # of materializing a (9P, L) im2col slab.
    t2 = None
    for g, dh in enumerate((-1, 0, 1)):
        taps = []
        for j, dw in enumerate((-1, 0, 1)):
            s = dh * W + dw
            shifted = t1 if s == 0 else pltpu.roll(t1, shift=(-s) % L, axis=1)
            if dh == 0 and dw == 0:
                taps.append(shifted)
            else:
                k = 3 * g + j
                taps.append(shifted * mask_ref[pl.ds(k, 1), :])
        grp = jnp.concatenate(taps, axis=0)                          # (3P, L)
        part = jnp.dot(w2_ref[g], grp.astype(matmul_dtype),
                       preferred_element_type=jnp.float32)
        t2 = part if t2 is None else t2 + part
    t2 = jnp.maximum(t2 + b2_ref[...], 0.0)                          # (P, L)

    # ---- conv3 (1x1) + bias + identity residual (re-read late) + relu ----
    t3 = jnp.dot(w3_ref[...], t2.astype(matmul_dtype),
                 preferred_element_type=jnp.float32)
    o_ref[0] = jnp.maximum(t3 + b3_ref[...] + x_ref[0], 0.0)         # (Cout, L)


def fold_bn(gamma, beta, mean, var):
    scale = gamma / jnp.sqrt(var + EPS)
    bias = beta - mean * scale
    return scale, bias


def _images_per_step(n, hw, lane_target=512, lane_cap=4096):
    """Pick how many images to pack onto the lane axis per grid step."""
    nb = 1
    for d in range(1, n + 1):
        if n % d or d * hw > lane_cap:
            continue
        nb = d
        if d * hw >= lane_target:
            break
    return nb


def bottleneck_forward(x_nchw, params, matmul_dtype=MATMUL_DTYPE):
    """x_nchw: (N, Cin, H, W) float32. Returns (N, 4*planes, H, W)."""
    (w1_oihw, bn1), (w2_oihw, bn2), (w3_oihw, bn3) = params
    N, Cin, H, W = x_nchw.shape
    P = w1_oihw.shape[0]
    Cout = w3_oihw.shape[0]
    assert Cout == Cin, "no-downsample Bottleneck requires inplanes == planes*4"
    HW = H * W

    nb = _images_per_step(N, HW)
    G = N // nb
    L = nb * HW

    # Pack nb images onto the lane axis: (G, Cin, nb*HW), channels on sublanes.
    x = (x_nchw.reshape(G, nb, Cin, HW)
               .transpose(0, 2, 1, 3)
               .reshape(G, Cin, L))

    # Fold BN scale into the conv weights (constant parameter prep, done once).
    s1, b1 = fold_bn(*bn1)
    s2, b2 = fold_bn(*bn2)
    s3, b3 = fold_bn(*bn3)
    w1 = (w1_oihw[:, :, 0, 0] * s1[:, None]).astype(matmul_dtype)       # (P, Cin)
    # conv2 weight grouped by kh, columns ordered (kw, cin) to match tap order.
    w2 = (jnp.transpose(w2_oihw, (2, 0, 3, 1)).reshape(3, P, 3 * P)
          * s2[None, :, None]).astype(matmul_dtype)                     # (3, P, 3P)
    w3 = (w3_oihw[:, :, 0, 0] * s3[:, None]).astype(matmul_dtype)       # (Cout, P)
    b1 = b1.reshape(P, 1)
    b2 = b2.reshape(P, 1)
    b3 = b3.reshape(Cout, 1)

    # Precompute the 9 border-validity masks once.  Using (lane % HW) means the
    # masks also zero the cross-image bleed introduced by the full-axis roll.
    pos = jnp.arange(L, dtype=jnp.int32) % HW
    hh = pos // W
    ww = pos % W
    masks = []
    for dh in (-1, 0, 1):
        for dw in (-1, 0, 1):
            valid = ((hh + dh >= 0) & (hh + dh < H) &
                     (ww + dw >= 0) & (ww + dw < W))
            masks.append(valid.astype(jnp.float32))
    mask = jnp.stack(masks, axis=0)                                     # (9, L)

    def const(shape):
        nd = len(shape)
        return pl.BlockSpec(shape, lambda g: (0,) * nd)

    kernel = functools.partial(bottleneck_kernel, W=W, matmul_dtype=matmul_dtype)

    out = pl.pallas_call(
        kernel,
        out_shape=jax.ShapeDtypeStruct((G, Cout, L), jnp.float32),
        grid_spec=pltpu.PrefetchScalarGridSpec(
            num_scalar_prefetch=0,
            grid=(G,),
            in_specs=[
                pl.BlockSpec((1, Cin, L), lambda g: (g, 0, 0)),
                const((9, L)),
                const((P, Cin)), const((P, 1)),
                const((3, P, 3 * P)), const((P, 1)),
                const((Cout, P)), const((Cout, 1)),
            ],
            out_specs=pl.BlockSpec((1, Cout, L), lambda g: (g, 0, 0)),
        ),
        compiler_params=pltpu.CompilerParams(
            dimension_semantics=("parallel",)),
    )(x, mask, w1, b1, w2, b2, w3, b3)

    return (out.reshape(G, Cout, nb, HW)
               .transpose(0, 2, 1, 3)
               .reshape(N, Cout, H, W))


# ---------------- pure-JAX reference (NCHW, mirrors the PyTorch forward) ----------------
def reference_forward(x, params):
    (w1, bn1), (w2, bn2), (w3, bn3) = params

    def conv(x, w, pad):
        return lax.conv_general_dilated(
            x, w, window_strides=(1, 1), padding=[(pad, pad), (pad, pad)],
            dimension_numbers=("NCHW", "OIHW", "NCHW"))

    def bn(x, p):
        g, b, m, v = p
        s = g / jnp.sqrt(v + EPS)
        return x * s[None, :, None, None] + (b - m * s)[None, :, None, None]

    out = jax.nn.relu(bn(conv(x, w1, 0), bn1))
    out = jax.nn.relu(bn(conv(out, w2, 1), bn2))
    out = bn(conv(out, w3, 0), bn3)
    return jax.nn.relu(out + x)


def make_params(key, inplanes, planes):
    ks = jax.random.split(key, 12)
    expansion = 4

    def bn_params(k, c):
        k1, k2, k3, k4 = jax.random.split(k, 4)
        gamma = 0.5 + jax.random.uniform(k1, (c,), jnp.float32)      # positive
        beta = 0.1 * jax.random.normal(k2, (c,), jnp.float32)
        mean = 0.1 * jax.random.normal(k3, (c,), jnp.float32)
        var = 0.5 + jax.random.uniform(k4, (c,), jnp.float32)        # positive
        return gamma, beta, mean, var

    w1 = 0.1 * jax.random.normal(ks[0], (planes, inplanes, 1, 1), jnp.float32)
    w2 = 0.1 * jax.random.normal(ks[1], (planes, planes, 3, 3), jnp.float32)
    w3 = 0.1 * jax.random.normal(ks[2], (planes * expansion, planes, 1, 1), jnp.float32)
    return ((w1, bn_params(ks[3], planes)),
            (w2, bn_params(ks[4], planes)),
            (w3, bn_params(ks[5], planes * expansion)))


if __name__ == "__main__":
    N, planes, H, W = 2, 8, 16, 16
    inplanes = planes * 4                           # 32 -> identity residual valid

    key = jax.random.PRNGKey(0)
    kx, kp = jax.random.split(key)
    x = jax.random.normal(kx, (N, inplanes, H, W), jnp.float32)
    params = make_params(kp, inplanes, planes)

    out = bottleneck_forward(x, params)
    out = jax.block_until_ready(out)

    ref = reference_forward(x, params)
    assert out.shape == (N, inplanes, H, W)
    assert jnp.allclose(out, ref, atol=1e-4, rtol=1e-4), (
        f"max abs err {jnp.max(jnp.abs(out - ref))}")

    print("KERNEL_OK")
</pallas_src>

<mosaic_0001>
module attributes {stable_mosaic.version = 11 : i64} {
  func.func @bottleneck_kernel(%arg0: i32, %arg1: memref<1x32x512xf32, #tpu.memory_space<vmem>>, %arg2: memref<9x512xf32, #tpu.memory_space<vmem>>, %arg3: memref<8x32xf32, #tpu.memory_space<vmem>>, %arg4: memref<8x1xf32, #tpu.memory_space<vmem>>, %arg5: memref<3x8x24xf32, #tpu.memory_space<vmem>>, %arg6: memref<8x1xf32, #tpu.memory_space<vmem>>, %arg7: memref<32x8xf32, #tpu.memory_space<vmem>>, %arg8: memref<32x1xf32, #tpu.memory_space<vmem>>, %arg9: memref<1x32x512xf32, #tpu.memory_space<vmem>>) attributes {dimension_semantics = [#tpu.dimension_semantics<parallel>], iteration_bounds = array<i64: 1>, scalar_prefetch = 0 : i64, scratch_operands = 0 : i64, tpu.core_type = #tpu.core_type<tc>, window_params = [{transform_indices = @transform_0, window_bounds = array<i64: 1, 32, 512>}, {pipeline_mode = #tpu.pipeline_mode<synchronous>, transform_indices = @transform_1, window_bounds = array<i64: 9, 512>}, {pipeline_mode = #tpu.pipeline_mode<synchronous>, transform_indices = @transform_2, window_bounds = array<i64: 8, 32>}, {pipeline_mode = #tpu.pipeline_mode<synchronous>, transform_indices = @transform_3, window_bounds = array<i64: 8, 1>}, {pipeline_mode = #tpu.pipeline_mode<synchronous>, transform_indices = @transform_4, window_bounds = array<i64: 3, 8, 24>}, {pipeline_mode = #tpu.pipeline_mode<synchronous>, transform_indices = @transform_5, window_bounds = array<i64: 8, 1>}, {pipeline_mode = #tpu.pipeline_mode<synchronous>, transform_indices = @transform_6, window_bounds = array<i64: 32, 8>}, {pipeline_mode = #tpu.pipeline_mode<synchronous>, transform_indices = @transform_7, window_bounds = array<i64: 32, 1>}, {transform_indices = @transform_8, window_bounds = array<i64: 1, 32, 512>}]} {
    %c0 = arith.constant 0 : index
    %c0_0 = arith.constant 0 : index
    %0 = vector.load %arg3[%c0, %c0_0] : memref<8x32xf32, #tpu.memory_space<vmem>>, vector<8x32xf32>
    %c0_1 = arith.constant 0 : index
    %c0_2 = arith.constant 0 : index
    %c0_3 = arith.constant 0 : index
    %1 = vector.load %arg1[%c0_1, %c0_2, %c0_3] : memref<1x32x512xf32, #tpu.memory_space<vmem>>, vector<1x32x512xf32>
    %2 = vector.shape_cast %1 : vector<1x32x512xf32> to vector<32x512xf32>
    %cst = arith.constant dense<0.000000e+00> : vector<8x512xf32>
    %3 = tpu.matmul %0, %2, %cst {dimension_numbers = #tpu.dot_dimension_numbers<[1], [0], [0], [1], [0, 0, 1, 1], [], []>} : vector<8x32xf32>, vector<32x512xf32>, vector<8x512xf32> -> vector<8x512xf32>
    %c0_4 = arith.constant 0 : index
    %c0_5 = arith.constant 0 : index
    %4 = vector.load %arg4[%c0_4, %c0_5] : memref<8x1xf32, #tpu.memory_space<vmem>>, vector<8x1xf32>
    %5 = vector.broadcast %4 : vector<8x1xf32> to vector<8x512xf32>
    %6 = arith.addf %3, %5 : vector<8x512xf32>
    %cst_6 = arith.constant 0.000000e+00 : f32
    %7 = vector.broadcast %cst_6 : f32 to vector<8x512xf32>
    %8 = arith.maximumf %6, %7 : vector<8x512xf32>
    %c17_i32 = arith.constant 17 : i32
    %9 = tpu.dynamic_rotate %8 by %c17_i32 dim 1 : vector<8x512xf32>, i32 -> vector<8x512xf32>
    %c0_7 = arith.constant 0 : index
    %c0_8 = arith.constant 0 : index
    %10 = vector.load %arg2[%c0_7, %c0_8] : memref<9x512xf32, #tpu.memory_space<vmem>>, vector<1x512xf32>
    %11 = vector.broadcast %10 : vector<1x512xf32> to vector<8x512xf32>
    %12 = arith.mulf %9, %11 : vector<8x512xf32>
    %c16_i32 = arith.constant 16 : i32
    %13 = tpu.dynamic_rotate %8 by %c16_i32 dim 1 : vector<8x512xf32>, i32 -> vector<8x512xf32>
    %c1 = arith.constant 1 : index
    %c0_9 = arith.constant 0 : index
    %14 = vector.load %arg2[%c1, %c0_9] : memref<9x512xf32, #tpu.memory_space<vmem>>, vector<1x512xf32>
    %15 = vector.broadcast %14 : vector<1x512xf32> to vector<8x512xf32>
    %16 = arith.mulf %13, %15 : vector<8x512xf32>
    %c15_i32 = arith.constant 15 : i32
    %17 = tpu.dynamic_rotate %8 by %c15_i32 dim 1 : vector<8x512xf32>, i32 -> vector<8x512xf32>
    %c2 = arith.constant 2 : index
    %c0_10 = arith.constant 0 : index
    %18 = vector.load %arg2[%c2, %c0_10] : memref<9x512xf32, #tpu.memory_space<vmem>>, vector<1x512xf32>
    %19 = vector.broadcast %18 : vector<1x512xf32> to vector<8x512xf32>
    %20 = arith.mulf %17, %19 : vector<8x512xf32>
    %21 = tpu.concatenate %12, %16, %20 in 0 : vector<8x512xf32>, vector<8x512xf32>, vector<8x512xf32> -> vector<24x512xf32>
    %c0_11 = arith.constant 0 : index
    %c0_12 = arith.constant 0 : index
    %c0_13 = arith.constant 0 : index
    %22 = vector.load %arg5[%c0_11, %c0_12, %c0_13] : memref<3x8x24xf32, #tpu.memory_space<vmem>>, vector<1x8x24xf32>
    %23 = vector.shape_cast %22 : vector<1x8x24xf32> to vector<8x24xf32>
    %cst_14 = arith.constant dense<0.000000e+00> : vector<8x512xf32>
    %24 = tpu.matmul %23, %21, %cst_14 {dimension_numbers = #tpu.dot_dimension_numbers<[1], [0], [0], [1], [0, 0, 1, 1], [], []>} : vector<8x24xf32>, vector<24x512xf32>, vector<8x512xf32> -> vector<8x512xf32>
    %c1_i32 = arith.constant 1 : i32
    %25 = tpu.dynamic_rotate %8 by %c1_i32 dim 1 : vector<8x512xf32>, i32 -> vector<8x512xf32>
    %c3 = arith.constant 3 : index
    %c0_15 = arith.constant 0 : index
    %26 = vector.load %arg2[%c3, %c0_15] : memref<9x512xf32, #tpu.memory_space<vmem>>, vector<1x512xf32>
    %27 = vector.broadcast %26 : vector<1x512xf32> to vector<8x512xf32>
    %28 = arith.mulf %25, %27 : vector<8x512xf32>
    %c511_i32 = arith.constant 511 : i32
    %29 = tpu.dynamic_rotate %8 by %c511_i32 dim 1 : vector<8x512xf32>, i32 -> vector<8x512xf32>
    %c5 = arith.constant 5 : index
    %c0_16 = arith.constant 0 : index
    %30 = vector.load %arg2[%c5, %c0_16] : memref<9x512xf32, #tpu.memory_space<vmem>>, vector<1x512xf32>
    %31 = vector.broadcast %30 : vector<1x512xf32> to vector<8x512xf32>
    %32 = arith.mulf %29, %31 : vector<8x512xf32>
    %33 = tpu.concatenate %28, %8, %32 in 0 : vector<8x512xf32>, vector<8x512xf32>, vector<8x512xf32> -> vector<24x512xf32>
    %c1_17 = arith.constant 1 : index
    %c0_18 = arith.constant 0 : index
    %c0_19 = arith.constant 0 : index
    %34 = vector.load %arg5[%c1_17, %c0_18, %c0_19] : memref<3x8x24xf32, #tpu.memory_space<vmem>>, vector<1x8x24xf32>
    %35 = vector.shape_cast %34 : vector<1x8x24xf32> to vector<8x24xf32>
    %cst_20 = arith.constant dense<0.000000e+00> : vector<8x512xf32>
    %36 = tpu.matmul %35, %33, %cst_20 {dimension_numbers = #tpu.dot_dimension_numbers<[1], [0], [0], [1], [0, 0, 1, 1], [], []>} : vector<8x24xf32>, vector<24x512xf32>, vector<8x512xf32> -> vector<8x512xf32>
    %37 = arith.addf %24, %36 : vector<8x512xf32>
    %c497_i32 = arith.constant 497 : i32
    %38 = tpu.dynamic_rotate %8 by %c497_i32 dim 1 : vector<8x512xf32>, i32 -> vector<8x512xf32>
    %c6 = arith.constant 6 : index
    %c0_21 = arith.constant 0 : index
    %39 = vector.load %arg2[%c6, %c0_21] : memref<9x512xf32, #tpu.memory_space<vmem>>, vector<1x512xf32>
    %40 = vector.broadcast %39 : vector<1x512xf32> to vector<8x512xf32>
    %41 = arith.mulf %38, %40 : vector<8x512xf32>
    %c496_i32 = arith.constant 496 : i32
    %42 = tpu.dynamic_rotate %8 by %c496_i32 dim 1 : vector<8x512xf32>, i32 -> vector<8x512xf32>
    %c7 = arith.constant 7 : index
    %c0_22 = arith.constant 0 : index
    %43 = vector.load %arg2[%c7, %c0_22] : memref<9x512xf32, #tpu.memory_space<vmem>>, vector<1x512xf32>
    %44 = vector.broadcast %43 : vector<1x512xf32> to vector<8x512xf32>
    %45 = arith.mulf %42, %44 : vector<8x512xf32>
    %c495_i32 = arith.constant 495 : i32
    %46 = tpu.dynamic_rotate %8 by %c495_i32 dim 1 : vector<8x512xf32>, i32 -> vector<8x512xf32>
    %c8 = arith.constant 8 : index
    %c0_23 = arith.constant 0 : index
    %47 = vector.load %arg2[%c8, %c0_23] : memref<9x512xf32, #tpu.memory_space<vmem>>, vector<1x512xf32>
    %48 = vector.broadcast %47 : vector<1x512xf32> to vector<8x512xf32>
    %49 = arith.mulf %46, %48 : vector<8x512xf32>
    %50 = tpu.concatenate %41, %45, %49 in 0 : vector<8x512xf32>, vector<8x512xf32>, vector<8x512xf32> -> vector<24x512xf32>
    %c2_24 = arith.constant 2 : index
    %c0_25 = arith.constant 0 : index
    %c0_26 = arith.constant 0 : index
    %51 = vector.load %arg5[%c2_24, %c0_25, %c0_26] : memref<3x8x24xf32, #tpu.memory_space<vmem>>, vector<1x8x24xf32>
    %52 = vector.shape_cast %51 : vector<1x8x24xf32> to vector<8x24xf32>
    %cst_27 = arith.constant dense<0.000000e+00> : vector<8x512xf32>
    %53 = tpu.matmul %52, %50, %cst_27 {dimension_numbers = #tpu.dot_dimension_numbers<[1], [0], [0], [1], [0, 0, 1, 1], [], []>} : vector<8x24xf32>, vector<24x512xf32>, vector<8x512xf32> -> vector<8x512xf32>
    %54 = arith.addf %37, %53 : vector<8x512xf32>
    %c0_28 = arith.constant 0 : index
    %c0_29 = arith.constant 0 : index
    %55 = vector.load %arg6[%c0_28, %c0_29] : memref<8x1xf32, #tpu.memory_space<vmem>>, vector<8x1xf32>
    %56 = vector.broadcast %55 : vector<8x1xf32> to vector<8x512xf32>
    %57 = arith.addf %54, %56 : vector<8x512xf32>
    %cst_30 = arith.constant 0.000000e+00 : f32
    %58 = vector.broadcast %cst_30 : f32 to vector<8x512xf32>
    %59 = arith.maximumf %57, %58 : vector<8x512xf32>
    %c0_31 = arith.constant 0 : index
    %c0_32 = arith.constant 0 : index
    %60 = vector.load %arg7[%c0_31, %c0_32] : memref<32x8xf32, #tpu.memory_space<vmem>>, vector<32x8xf32>
    %cst_33 = arith.constant dense<0.000000e+00> : vector<32x512xf32>
    %61 = tpu.matmul %60, %59, %cst_33 {dimension_numbers = #tpu.dot_dimension_numbers<[1], [0], [0], [1], [0, 0, 1, 1], [], []>} : vector<32x8xf32>, vector<8x512xf32>, vector<32x512xf32> -> vector<32x512xf32>
    %c0_34 = arith.constant 0 : index
    %c0_35 = arith.constant 0 : index
    %62 = vector.load %arg8[%c0_34, %c0_35] : memref<32x1xf32, #tpu.memory_space<vmem>>, vector<32x1xf32>
    %63 = vector.broadcast %62 : vector<32x1xf32> to vector<32x512xf32>
    %64 = arith.addf %61, %63 : vector<32x512xf32>
    %c0_36 = arith.constant 0 : index
    %c0_37 = arith.constant 0 : index
    %c0_38 = arith.constant 0 : index
    %65 = vector.load %arg1[%c0_36, %c0_37, %c0_38] : memref<1x32x512xf32, #tpu.memory_space<vmem>>, vector<1x32x512xf32>
    %66 = vector.shape_cast %65 : vector<1x32x512xf32> to vector<32x512xf32>
    %67 = arith.addf %64, %66 : vector<32x512xf32>
    %cst_39 = arith.constant 0.000000e+00 : f32
    %68 = vector.broadcast %cst_39 : f32 to vector<32x512xf32>
    %69 = arith.maximumf %67, %68 : vector<32x512xf32>
    %c0_40 = arith.constant 0 : index
    %c0_41 = arith.constant 0 : index
    %c0_42 = arith.constant 0 : index
    %70 = vector.load %arg9[%c0_40, %c0_41, %c0_42] : memref<1x32x512xf32, #tpu.memory_space<vmem>>, vector<1x32x512xf32>
    %71 = vector.shape_cast %70 : vector<1x32x512xf32> to vector<32x512xf32>
    %72 = vector.shape_cast %69 : vector<32x512xf32> to vector<1x32x512xf32>
    tpu.vector_store %arg9[%c0_40, %c0_41, %c0_42], %72 {strides = array<i32>} : memref<1x32x512xf32, #tpu.memory_space<vmem>>, vector<1x32x512xf32>,
    return
  }
  func.func @transform_0(%arg0: i32) -> (i32, i32, i32) {
    %c0_i32 = arith.constant 0 : i32
    %c0_i32_0 = arith.constant 0 : i32
    %c0_i32_1 = arith.constant 0 : i32
    return %arg0, %c0_i32, %c0_i32_0 : i32, i32, i32
  }
  func.func @transform_1(%arg0: i32) -> (i32, i32) {
    %c0_i32 = arith.constant 0 : i32
    %c0_i32_0 = arith.constant 0 : i32
    %c0_i32_1 = arith.constant 0 : i32
    return %c0_i32, %c0_i32_0 : i32, i32
  }
  func.func @transform_2(%arg0: i32) -> (i32, i32) {
    %c0_i32 = arith.constant 0 : i32
    %c0_i32_0 = arith.constant 0 : i32
    %c0_i32_1 = arith.constant 0 : i32
    return %c0_i32, %c0_i32_0 : i32, i32
  }
  func.func @transform_3(%arg0: i32) -> (i32, i32) {
    %c0_i32 = arith.constant 0 : i32
    %c0_i32_0 = arith.constant 0 : i32
    %c0_i32_1 = arith.constant 0 : i32
    return %c0_i32, %c0_i32_0 : i32, i32
  }
  func.func @transform_4(%arg0: i32) -> (i32, i32, i32) {
    %c0_i32 = arith.constant 0 : i32
    %c0_i32_0 = arith.constant 0 : i32
    %c0_i32_1 = arith.constant 0 : i32
    %c0_i32_2 = arith.constant 0 : i32
    return %c0_i32, %c0_i32_0, %c0_i32_1 : i32, i32, i32
  }
  func.func @transform_5(%arg0: i32) -> (i32, i32) {
    %c0_i32 = arith.constant 0 : i32
    %c0_i32_0 = arith.constant 0 : i32
    %c0_i32_1 = arith.constant 0 : i32
    return %c0_i32, %c0_i32_0 : i32, i32
  }
  func.func @transform_6(%arg0: i32) -> (i32, i32) {
    %c0_i32 = arith.constant 0 : i32
    %c0_i32_0 = arith.constant 0 : i32
    %c0_i32_1 = arith.constant 0 : i32
    return %c0_i32, %c0_i32_0 : i32, i32
  }
  func.func @transform_7(%arg0: i32) -> (i32, i32) {
    %c0_i32 = arith.constant 0 : i32
    %c0_i32_0 = arith.constant 0 : i32
    %c0_i32_1 = arith.constant 0 : i32
    return %c0_i32, %c0_i32_0 : i32, i32
  }
  func.func @transform_8(%arg0: i32) -> (i32, i32, i32) {
    %c0_i32 = arith.constant 0 : i32
    %c0_i32_0 = arith.constant 0 : i32
    %c0_i32_1 = arith.constant 0 : i32
    return %arg0, %c0_i32, %c0_i32_0 : i32, i32, i32
  }
}

</mosaic_0001>

<bundles_post_ra>
// kernel: tpu_custom_call.1
= control target key start
LH: loop header
LB: loop body
LE: loop exit
PB: predicated region body
PF: predicated region fallthrough
CT: control target
= control target key end

     0   :  { %13 = vsyncpa [#allocation3], 0  ;;  %s1943_s0 = inlined_call_operand.hbm [shape: f32[1,32,512], index: 0, kind: input, shape index: {}]   ;;  %s1944_s1 = inlined_call_operand.vmem [shape: f32[9,512], index: 1, kind: input, shape index: {}]   ;;  %s1945_s2 = inlined_call_operand.vmem [shape: f32[8,32], index: 2, kind: input, shape index: {}]   ;;  %s1946_s3 = inlined_call_operand.vmem [shape: f32[8,1], index: 3, kind: input, shape index: {}]   ;;  %s1947_s4 = inlined_call_operand.vmem [shape: f32[3,8,24], index: 4, kind: input, shape index: {}]   ;;  %s1948_s5 = inlined_call_operand.vmem [shape: f32[8,1], index: 5, kind: input, shape index: {}]   ;;  %s1949_s6 = inlined_call_operand.vmem [shape: f32[32,8], index: 6, kind: input, shape index: {}]   ;;  %s1950_s7 = inlined_call_operand.vmem [shape: f32[32,1], index: 7, kind: input, shape index: {}]   ;;  %s1951_s8 = inlined_call_operand.hbm [shape: f32[1,32,512], index: 8, kind: output, shape index: {}]  }
   0x1   :  { %14 = vsyncpa [#allocation4], 0  ;;  %s1418_s27 = smov [#allocation2]   ;;  %s1370_s9 = scalar_lea.hbm %s1943_s0, 2048 }
   0x2   :  { %s20_s28 = sshll.u32 %s1418_s27, 4  ;;  %p1371_p0 = scmp.ne.s32.totalorder %s1943_s0, %s1370_s9  ;;  %s21_s28 = int_to_ptr.vmem [resolvable:$true] %s20_s28 }
   0x3   :  { %p1374_p1 = scmp.lt.u32.totalorder %s1370_s9, %s1943_s0 }
   0x5   :  { %p1376_p2 = pnand %p1374_p1, %p1371_p0 }
   0x7   :  { %1379 = shalt.err (!%p1376_p2)
}
   0x8   :  { %s1380_s14 = scalar_lea.vmem %s21_s28, 2048  ;;  %p1385_p4 = scmp.lt.s32.totalorder %s21_s28, %s21_s28 }
   0x9   :  { %p1381_p3 = scmp.ne.s32.totalorder %s21_s28, %s1380_s14  ;;  %p1386_p5 = scmp.lt.s32.totalorder %s1380_s14, %s1380_s14 }
   0xb   :  { %p1387_p6 = por %p1386_p5, %p1385_p4 }
   0xd   :  { %p1388_p7 = pnand %p1387_p6, %p1381_p3 }
   0xf   :  { %1391 = shalt.err (!%p1388_p7)
}
  0x10   :  { %s1419_s15 = smov 512   ;;  %s1420_s16 = smov 32  }
  0x11   :  { %26 = dma.hbm_to_vmem [thread:$0]  %s1943_s0, 2048, %s21_s28, [#allocation3], %s1419_s15, %s1419_s15, %s1420_s16  }
  0x12   :  { %1414 = dma.done.wait [#allocation3], 2048  }
  0x13   :  { %1415 = vsyncadd [#allocation3], 4294965248  ;;  %v1952_v0 = vmov 0.0   ;;  %v1422_v1 = vmov 0   ;;  %v1494_v2 = vld [vmem:[#allocation2 + $0x8] sm:$0xff]  ;;  %v1498_v4 = vld [vmem:[#allocation2 + $0x18] sm:$0xff]  ;;  %v225_v46 = vlaneseq }
  0x14   :  { %135 = vmatprep.mubr.f32.mxu0 %v1952_v0  ;;  %206 = vmatprep.mubr.f32.mxu1 %v1952_v0  ;;  %v1496_v3 = vld [vmem:[#allocation2 + $0x28] sm:$0xff]  ;;  %v1502_v6 = vld [vmem:[#allocation2 + $0x38] sm:$0xff]  ;;  %v1504_v7 = vld [vmem:[#allocation2] sm:$0xff]  ;;  %vm67_vm0 = vcmask 261120   ;;  %s1425_s22 = smov 17   ;;  %s1426_s23 = smov 16  }
  0x15   :  { %1368 = vset.pattern.permute.xlu0 %v1422_v1  ;;  %1369 = vset.pattern.permute.xlu1 %v1422_v1  ;;  %v1306_v5 = vpack.c.bf16 %v1496_v3, %v1494_v2  ;;  %v1506_v8 = vld [vmem:[#allocation2 + $0x20] sm:$0xff]  ;;  %v1314_v9 = vpack.c.bf16 %v1502_v6, %v1498_v4  ;;  %v1512_v11 = vld [vmem:[#allocation2 + $0x10] sm:$0xff]  ;;  %v1516_v13 = vld [vmem:[#allocation2 + $0x48] sm:$0xff]  ;;  %s1427_s24 = smov 15   ;;  %s1428_s25 = smov 113   ;;  %v235_v47 = vshrl.u32 %v225_v46, 7 }
  0x16   :  { %v1308_v10 = vpack.c.bf16 %v1506_v8, %v1504_v7  ;;  %v1514_v12 = vld [vmem:[#allocation2 + $0x30] sm:$0xff]  ;;  %v1520_v15 = vld [vmem:[#allocation2 + $0x68] sm:$0xff]  ;;  %v1522_v16 = vld [vmem:[#allocation2 + $0x58] sm:$0xff]  ;;  %s1429_s26 = smov 112   ;;  %s1430_s27 = smov 111   ;;  %v1605_v48 = vand.u32 127, %v225_v46 }
  0x17   :  { %1307 = vmatprep.subr.bf16.mxu0 %v1306_v5  ;;  %v1316_v14 = vpack.c.bf16 %v1514_v12, %v1512_v11  ;;  %1958 = vst [vmem:[#allocation8_spill] sm:$0xff] %v1520_v15  ;;  %v1524_v17 = vld [vmem:[#allocation2 + $0x78] sm:$0xff]  ;;  %1315 = vmatprep.subr.bf16.mxu1 %v1314_v9  ;;  %v1310_v18 = vpack.c.bf16 %v1520_v15, %v1516_v13  ;;  %v1530_v20 = vld [vmem:[#allocation2 + $0x40] sm:$0xff]  ;;  %v1534_v22 = vld [vmem:[#allocation2 + $0x50] sm:$0xff]  ;;  %v1607_v49 = vsub.s32 3, %v235_v47  ;;  %vm421_vm6 = vcmask 195584  }
  0x18   :  { %1959 = vst [vmem:[#allocation9_spill] sm:$0xff] %v1524_v17  ;;  %1309 = vmatpush1.bf16.msra.mxu0 %v1308_v10  ;;  %v1318_v19 = vpack.c.bf16 %v1524_v17, %v1522_v16  ;;  %v1532_v21 = vld [vmem:[#allocation2 + $0x60] sm:$0xff]  ;;  %v1538_v24 = vld [vmem:[#allocation2 + $0x70] sm:$0xff]  ;;  %v1002_v44 = vld [vmem:[%s1950_s7 + $0x8] sm:$0xff]  ;;  %vm347_vm1 = vcmp.lt.s32.totalorder %v1605_v48, 1  ;;  %vm387_vm2 = vcmp.lt.s32.totalorder %v1605_v48, 127 }
  0x19   :  { %1960 = vst [vmem:[#allocation10_spill] sm:$0xff] %v1532_v21  ;;  %1317 = vmatpush1.bf16.msra.mxu1 %v1316_v14  ;;  %v1312_v23 = vpack.c.bf16 %v1532_v21, %v1530_v20  ;;  %1961 = vst [vmem:[#allocation11_spill] sm:$0xff] %v1538_v24  ;;  %v61_v25 = vld [vmem:[%s1946_s3] sm:$0xff]  ;;  %1311 = vmatprep.subr.bf16.mxu0 %v1310_v18  ;;  %v1320_v26 = vpack.c.bf16 %v1538_v24, %v1534_v22  ;;  %s1424_s3 = smov 127   ;;  %v1003_v42 = vld [vmem:[%s1950_s7 + $0x10] sm:$0xff]  ;;  %v1634_v18 = vsub.s32 0, %v235_v47 }
  0x1a   :  { %1319 = vmatprep.subr.bf16.mxu1 %v1318_v19  ;;  %64 = vperm.xlu0 %1368, %v61_v25   ;;  %v44_v27 = vld [vmem:[%s1945_s2] sm:$0xff]  ;;  %s1423_s2 = smov 1   ;;  %v1004_v45 = vld [vmem:[%s1950_s7 + $0x18] sm:$0xff]  ;;  %v1636_v19 = vsub.s32 1, %v235_v47  ;;  %vm227_vm3 = vcmp.lt.s32.totalorder %v1605_v48, 17  ;;  %vm266_vm4 = vcmp.lt.s32.totalorder %v1605_v48, 16 }
  0x1b   :  { %v1001_v41 = vld [vmem:[%s1950_s7] sm:$0xff]  ;;  %vm306_vm5 = vcmp.lt.s32.totalorder %v1605_v48, 15  ;;  %vm760_vm7 = vcmp.lt.s32.totalorder %v1605_v48, 112  ;;  %vm720_vm8 = vcmp.lt.s32.totalorder %v1605_v48, 113  ;;  %vm800_vm9 = vcmp.lt.s32.totalorder %v1605_v48, 111 }
  0x1c   :  { %1313 = vmatpush1.bf16.msra.mxu0 %v1312_v23  ;;  %v983_v43 = vld [vmem:[%s1948_s5] sm:$0xff]  ;;  %v1638_v23 = vsub.s32 2, %v235_v47  ;;  %vm1025_vm10 = vcmask 64512  }
  0x1d   :  { %1321 = vmatpush1.bf16.msra.mxu1 %v1320_v26  ;;  %v1612_v50 = vld [vmem:[%s1944_s1 + $0x3] ss:$8 sm:$0xf]  ;;  %v1643_v26 = vld [vmem:[%s1944_s1 + $0x5] ss:$8 sm:$0xf] }
  0x1e   :  { %v370_v53 = vrot.slane %v1612_v50, %v1607_v49  ;;  %v1693_v47 = vld [vmem:[%s1944_s1 + $0x6] ss:$8 sm:$0xf] }
  0x1f   :  { %1281 = vmatmul.mubr.msk.f32.vlgmr.msra.gmra.mrb[0].mxu0 %vm67_vm0, %v44_v27 }
  0x20   :  { %1282 = vmatmul.mubr.msk.f32.vlgmr.msra.gmra.mrb[0].mxu1 %vm67_vm0, %v44_v27  ;;  %489 = vmatprep.mubr.f32.mxu0 %v1952_v0 }
  0x21   :  { %560 = vmatprep.mubr.f32.mxu1 %v1952_v0 }
  0x99   :  { %v65_v28 = vpop.permute.xlu0 %64 }
  0xf2   :  { %v137_v29 = vpop.f32.mrb[0].mxu0 }
  0xf3   :  { %v138_v30 = vadd.f32 %v137_v29, %v65_v28  ;;  %v208_v31 = vpop.f32.mrb[0].mxu1  ;;  %v139_v32 = vpop.f32.mrb[1].mxu0  ;;  %v1652_v29 = vld [vmem:[%s1944_s1] ss:$8 sm:$0xf] }
  0xf4   :  { %v209_v33 = vadd.f32 %v208_v31, %v65_v28  ;;  %v210_v34 = vpop.f32.mrb[1].mxu1  ;;  %v140_v38 = vadd.f32 %v139_v32, %v65_v28  ;;  %v402_v32 = vrot.slane %v1643_v26, %v1636_v19  ;;  %v249_v46 = vrot.slane %v1652_v29, %v1607_v49 }
  0xf5   :  { %v1550_v35 = vmax.f32 %v138_v30, 0.0  ;;  %v211_v36 = vadd.f32 %v210_v34, %v65_v28  ;;  %v358_v28 = vrot.slane %v1612_v50, %v1634_v18  ;;  %v1667_v34 = vld [vmem:[%s1944_s1 + $0x1] ss:$8 sm:$0xf] }
  0xf6   :  { %v1552_v37 = vmax.f32 %v209_v33, 0.0  ;;  %v1560_v40 = vmax.f32 %v140_v38, 0.0  ;;  %v406_v33 = vrot.slane %v1643_v26, %v1638_v23  ;;  %v410_v38 = vrot.slane %v1643_v26, %v1607_v49 }
  0xf7   :  { %339 = vrot.lane.b32.xlu0 %v1550_v35, %s1423_s2  ;;  %v1556_v39 = vmax.f32 %v211_v36, 0.0 }
  0xf8   :  { %343 = vrot.lane.b32.xlu1 %v1552_v37, %s1423_s2 }
  0xfb   :  { %345 = vrot.lane.b32.xlu0 %v1556_v39, %s1423_s2 }
  0xfc   :  { %379 = vrot.lane.b32.xlu1 %v1550_v35, %s1424_s3 }
  0xff   :  { %381 = vrot.lane.b32.xlu0 %v1560_v40, %s1424_s3 }
 0x100   :  { %383 = vrot.lane.b32.xlu1 %v1552_v37, %s1424_s3 }
 0x103   :  { %385 = vrot.lane.b32.xlu0 %v1556_v39, %s1424_s3 }
 0x104   :  { %217 = vrot.lane.b32.xlu1 %v1550_v35, %s1425_s22 }
 0x107   :  { %219 = vrot.lane.b32.xlu0 %v1560_v40, %s1425_s22 }
 0x108   :  { %221 = vrot.lane.b32.xlu1 %v1552_v37, %s1425_s22 }
 0x10b   :  { %223 = vrot.lane.b32.xlu0 %v1556_v39, %s1425_s22 }
 0x10c   :  { %258 = vrot.lane.b32.xlu1 %v1550_v35, %s1426_s23 }
 0x10f   :  { %260 = vrot.lane.b32.xlu0 %v1560_v40, %s1426_s23 }
 0x110   :  { %262 = vrot.lane.b32.xlu1 %v1552_v37, %s1426_s23 }
 0x113   :  { %264 = vrot.lane.b32.xlu0 %v1556_v39, %s1426_s23 }
 0x114   :  { %298 = vrot.lane.b32.xlu1 %v1550_v35, %s1427_s24 }
 0x117   :  { %300 = vrot.lane.b32.xlu0 %v1560_v40, %s1427_s24 }
 0x118   :  { %302 = vrot.lane.b32.xlu1 %v1552_v37, %s1427_s24 }
 0x11b   :  { %304 = vrot.lane.b32.xlu0 %v1556_v39, %s1427_s24 }
 0x11c   :  { %341 = vrot.lane.b32.xlu1 %v1560_v40, %s1423_s2 }
 0x11f   :  { %714 = vrot.lane.b32.xlu0 %v1560_v40, %s1428_s25 }
 0x120   :  { %712 = vrot.lane.b32.xlu1 %v1550_v35, %s1428_s25 }
 0x123   :  { %718 = vrot.lane.b32.xlu0 %v1556_v39, %s1428_s25 }
 0x124   :  { %716 = vrot.lane.b32.xlu1 %v1552_v37, %s1428_s25 }
 0x127   :  { %754 = vrot.lane.b32.xlu0 %v1560_v40, %s1429_s26 }
 0x128   :  { %752 = vrot.lane.b32.xlu1 %v1550_v35, %s1429_s26 }
 0x12b   :  { %758 = vrot.lane.b32.xlu0 %v1556_v39, %s1429_s26 }
 0x12c   :  { %756 = vrot.lane.b32.xlu1 %v1552_v37, %s1429_s26 }
 0x12f   :  { %794 = vrot.lane.b32.xlu0 %v1560_v40, %s1430_s27 }
 0x130   :  { %792 = vrot.lane.b32.xlu1 %v1550_v35, %s1430_s27 }
 0x133   :  { %798 = vrot.lane.b32.xlu0 %v1556_v39, %s1430_s27 }
 0x134   :  { %796 = vrot.lane.b32.xlu1 %v1552_v37, %s1430_s27 }
 0x137   :  { %1007 = vperm.xlu0 %1368, %v1001_v41  }
 0x138   :  { %986 = vperm.xlu1 %1369, %v983_v43   ;;  %v1683_v43 = vld [vmem:[%s1944_s1 + $0x2] ss:$8 sm:$0xf] }
 0x13b   :  { %1017 = vperm.xlu0 %1368, %v1003_v42  }
 0x13c   :  { %1012 = vperm.xlu1 %1369, %v1002_v44  }
 0x140   :  { %1022 = vperm.xlu1 %1369, %v1004_v45  }
 0x169   :  { %v1614_v51 = vpop.permute.xlu0 %339 }
 0x16a   :  { %v344_v52 = vpop.permute.xlu1 %343 }
 0x16d   :  { %v346_v54 = vpop.permute.xlu0 %345 }
 0x16e   :  { %v1619_v55 = vpop.permute.xlu1 %379  ;;  %v348_v56 = vsel %vm347_vm1, %v344_v52, %v346_v54  ;;  %v351_v30 = vsel %vm347_vm1, %v346_v54, %v1614_v51  ;;  %v285_v54 = vrot.slane %v1667_v34, %v1638_v23 }
 0x16f   :  { %v378_v57 = vmul.f32 %v370_v53, %v348_v56  ;;  %v375_v44 = vmul.f32 %v358_v28, %v351_v30  ;;  %v281_v53 = vrot.slane %v1667_v34, %v1636_v19  ;;  %v362_v56 = vrot.slane %v1612_v50, %v1636_v19 }
 0x170   :  { %v289_v28 = vrot.slane %v1667_v34, %v1607_v49 }
 0x171   :  { %v382_v58 = vpop.permute.xlu0 %381  ;;  %v1326_v59 = vpack.c.bf16 %v1556_v39, %v378_v57  ;;  %v241_v39 = vrot.slane %v1652_v29, %v1636_v19  ;;  %v366_v57 = vrot.slane %v1612_v50, %v1638_v23  ;;  %v1324_v30 = vpack.c.bf16 %v1550_v35, %v375_v44 }
 0x172   :  { %v384_v60 = vpop.permute.xlu1 %383 }
 0x173   :  { %1327 = vmatprep.subr.bf16.mxu1 %v1326_v59  ;;  %v277_v59 = vrot.slane %v1667_v34, %v1634_v18  ;;  %v389_v35 = vsel %vm387_vm2, %v382_v58, %v384_v60 }
 0x174   :  { %v416_v24 = vmul.f32 %v402_v32, %v389_v35 }
 0x175   :  { %v386_v61 = vpop.permute.xlu0 %385 }
 0x176   :  { %v1624_v62 = vpop.permute.xlu1 %217  ;;  %v391_v50 = vsel %vm387_vm2, %v386_v61, %v1619_v55 }
 0x179   :  { %v1626_v63 = vpop.permute.xlu0 %219 }
 0x17a   :  { %v1628_v1 = vpop.permute.xlu1 %221 }
 0x17d   :  { %v1630_v5 = vpop.permute.xlu0 %223 }
 0x17e   :  { %v1632_v9 = vpop.permute.xlu1 %258 }
 0x181   :  { %v261_v10 = vpop.permute.xlu0 %260 }
 0x182   :  { %v263_v14 = vpop.permute.xlu1 %262 }
 0x185   :  { %v265_v25 = vpop.permute.xlu0 %264 }
 0x186   :  { %v1645_v27 = vpop.permute.xlu1 %298  ;;  %v267_v15 = vsel %vm266_vm4, %v263_v14, %v265_v25 }
 0x187   :  { %v297_v31 = vmul.f32 %v289_v28, %v267_v15 }
 0x189   :  { %v1669_v36 = vpop.permute.xlu0 %300 }
 0x18a   :  { %v1678_v42 = vpop.permute.xlu1 %302 }
 0x18b   :  { %v308_v35 = vsel %vm306_vm5, %v1669_v36, %v1678_v42 }
 0x18d   :  { %v1711_v45 = vpop.permute.xlu0 %304 }
 0x18e   :  { %v342_v41 = vpop.permute.xlu1 %341 }
 0x18f   :  { %v349_v0 = vsel %vm347_vm1, %v342_v41, %v344_v52  ;;  %v350_v17 = vsel %vm347_vm1, %v1614_v51, %v342_v41  ;;  %v390_v52 = vsel %vm387_vm2, %v1619_v55, %v382_v58  ;;  %v388_v51 = vsel %vm387_vm2, %v384_v60, %v386_v61 }
 0x190   :  { %v376_v34 = vmul.f32 %v362_v56, %v350_v17  ;;  %v377_v21 = vmul.f32 %v366_v57, %v349_v0  ;;  %v269_v41 = vsel %vm266_vm4, %v1632_v9, %v261_v10  ;;  %v228_v0 = vsel %vm227_vm3, %v1628_v1, %v1630_v5 }
 0x191   :  { %v1744_v44 = vpop.permute.xlu0 %714  ;;  %v268_v17 = vsel %vm266_vm4, %v261_v10, %v263_v14  ;;  %v418_v60 = vmul.f32 %v410_v38, %v391_v50  ;;  %v230_v61 = vsel %vm227_vm3, %v1624_v62, %v1626_v63  ;;  %v270_v57 = vsel %vm266_vm4, %v265_v25, %v1632_v9 }
 0x192   :  { %v1328_v56 = vpack.c.bf16 %v1552_v37, %v377_v21  ;;  %v1753_v55 = vpop.permute.xlu1 %712  ;;  %v1322_v58 = vpack.c.bf16 %v1560_v40, %v376_v34  ;;  %v229_v21 = vsel %vm227_vm3, %v1626_v63, %v1628_v1  ;;  %v295_v37 = vmul.f32 %v281_v53, %v269_v41  ;;  %v1293_v63 = vld [vmem:[%s1944_s1 + $0x7] ss:$8 sm:$0xf] }
 0x193   :  { %v231_v40 = vsel %vm227_vm3, %v1630_v5, %v1624_v62  ;;  %v257_v10 = vmul.f32 %v249_v46, %v228_v0  ;;  %v296_v14 = vmul.f32 %v285_v54, %v268_v17  ;;  %v417_v9 = vmul.f32 %v406_v33, %v388_v51 }
 0x194   :  { %1323 = vmatprep.subr.bf16.mxu0 %v1322_v58  ;;  %1329 = vmatpush1.bf16.msra.mxu1 %v1328_v56  ;;  %v255_v25 = vmul.f32 %v241_v39, %v230_v61  ;;  %v294_v32 = vmul.f32 %v277_v59, %v270_v57  ;;  %v1962_v62 = vrot.slane %v1643_v26, %v1634_v18 }
 0x195   :  { %1325 = vmatpush1.bf16.msra.mxu0 %v1324_v30  ;;  %500 = vmatprep.subr.mxu1 %v418_v60  ;;  %v719_v15 = vpop.permute.xlu0 %718  ;;  %v1963_v5 = vrot.slane %v1652_v29, %v1638_v23  ;;  %v307_v33 = vsel %vm306_vm5, %v1678_v42, %v1711_v45  ;;  %v1334_v39 = vpack.c.bf16 %v297_v31, %v257_v10 }
 0x196   :  { %v717_v38 = vpop.permute.xlu1 %716  ;;  %429 = vmatprep.subr.mxu0 %v416_v24  ;;  %v415_v1 = vmul.f32 %v1962_v62, %v390_v52  ;;  %v1287_v24 = vld [vmem:[%s1947_s4 + $0x8] sm:$0xff]  ;;  %v1964_v53 = vrot.slane %v1652_v29, %v1634_v18  ;;  %v309_v26 = vsel %vm306_vm5, %v1645_v27, %v1669_v36  ;;  %v743_v59 = vrot.slane %v1693_v47, %v1607_v49 }
 0x197   :  { %v256_v46 = vmul.f32 %v1963_v5, %v229_v21  ;;  %v1330_v28 = vpack.c.bf16 %v295_v37, %v255_v25  ;;  %v771_v31 = vrot.slane %v1293_v63, %v1634_v18  ;;  %v783_v29 = vrot.slane %v1293_v63, %v1607_v49 }
 0x198   :  { %v254_v54 = vmul.f32 %v1964_v53, %v231_v40  ;;  %501 = vmatpush1.msra.mxu1 %v417_v9  ;;  %v1965_v52 = vrot.slane %v1683_v43, %v1607_v49  ;;  %v1966_v0 = vrot.slane %v1683_v43, %v1636_v19  ;;  %v310_v56 = vsel %vm306_vm5, %v1711_v45, %v1645_v27 }
 0x199   :  { %v1336_v30 = vpack.c.bf16 %v296_v14, %v256_v46  ;;  %430 = vmatpush1.msra.mxu0 %v415_v1  ;;  %1335 = vmatprep.subr.bf16.mxu1 %v1334_v39  ;;  %v755_v50 = vpop.permute.xlu0 %754  ;;  %v724_v36 = vsel %vm720_vm8, %v719_v15, %v1753_v55  ;;  %v775_v58 = vrot.slane %v1293_v63, %v1636_v19  ;;  %v1968_v37 = vmov 0.0  }
 0x19a   :  { %v1332_v34 = vpack.c.bf16 %v294_v32, %v254_v54  ;;  %v337_v51 = vmul.f32 %v1965_v52, %v307_v33  ;;  %v753_v41 = vpop.permute.xlu1 %752  ;;  %1289 = vmatmul.mubr.msk.f32.vlgmr.msra.gmra.mrb[2].mxu1 %vm421_vm6, %v1287_v24  ;;  %1331 = vmatprep.subr.bf16.mxu0 %v1330_v28  ;;  %v335_v17 = vmul.f32 %v1966_v0, %v309_v26  ;;  %v1294_v28 = vld [vmem:[%s1944_s1 + $0x20] ss:$8 sm:$0xf] }
 0x19b   :  { %1337 = vmatpush1.bf16.msra.mxu1 %v1336_v30  ;;  %1288 = vmatmul.mubr.msk.f32.vlgmr.msra.gmra.mrb[2].mxu0 %vm421_vm6, %v1287_v24  ;;  %v763_v42 = vsel %vm760_vm7, %v753_v41, %v755_v50  ;;  %v779_v60 = vrot.slane %v1293_v63, %v1638_v23  ;;  %v1967_v61 = vrot.slane %v1683_v43, %v1638_v23 }
 0x19c   :  { %1333 = vmatpush1.bf16.msra.mxu0 %v1332_v34  ;;  %645 = vmatprep.subr.mxu1 %v337_v51  ;;  %v722_v45 = vsel %vm720_vm8, %v1744_v44, %v717_v38  ;;  %v721_v57 = vsel %vm720_vm8, %v717_v38, %v719_v15  ;;  %v1969_v40 = vrot.slane %v1683_v43, %v1634_v18 }
 0x19d   :  { %v336_v27 = vmul.f32 %v1967_v61, %v308_v35  ;;  %574 = vmatprep.subr.mxu0 %v335_v17  ;;  %v759_v21 = vpop.permute.xlu0 %758  ;;  %634 = vmatprep.mubr.f32.mxu0 %v1968_v37  ;;  %v723_v14 = vsel %vm720_vm8, %v1753_v55, %v1744_v44  ;;  %v751_v9 = vmul.f32 %v743_v59, %v724_v36  ;;  %v338_v44 = vld [vmem:[%s1947_s4] sm:$0xff]  ;;  %v1295_v17 = vld [vmem:[%s1947_s4 + $0x10] sm:$0xff] }
 0x19e   :  { %v334_v10 = vmul.f32 %v1969_v40, %v310_v56  ;;  %v757_v25 = vpop.permute.xlu1 %756  ;;  %v764_v32 = vsel %vm760_vm7, %v759_v21, %v753_v41  ;;  %705 = vmatprep.mubr.f32.mxu1 %v1968_v37  ;;  %v788_v15 = vmul.f32 %v771_v31, %v763_v42  ;;  %v1970_v55 = vrot.slane %v1693_v47, %v1636_v19 }
 0x19f   :  { %v762_v38 = vsel %vm760_vm7, %v755_v50, %v757_v25  ;;  %646 = vmatpush1.msra.mxu1 %v336_v27  ;;  %v761_v43 = vsel %vm760_vm7, %v757_v25, %v759_v21  ;;  %v791_v63 = vmul.f32 %v783_v29, %v764_v32  ;;  %v1971_v1 = vrot.slane %v1693_v47, %v1638_v23  ;;  %v998_v25 = vld [vmem:[%s1949_s6 + $0x8] sm:$0xff]  ;;  %v999_v32 = vld [vmem:[%s1949_s6 + $0x10] sm:$0xff] }
 0x1a0   :  { %v749_v62 = vmul.f32 %v1970_v55, %v722_v45  ;;  %v789_v46 = vmul.f32 %v775_v58, %v762_v38  ;;  %v790_v33 = vmul.f32 %v779_v60, %v761_v43  ;;  %575 = vmatpush1.msra.mxu0 %v334_v10  ;;  %v1972_v39 = vrot.slane %v1693_v47, %v1634_v18 }
 0x1a1   :  { %v750_v5 = vmul.f32 %v1971_v1, %v721_v57  ;;  %v795_v53 = vpop.permute.xlu0 %794  ;;  %v1342_v54 = vpack.c.bf16 %v791_v63, %v751_v9  ;;  %v823_v47 = vrot.slane %v1294_v28, %v1607_v49  ;;  %v815_v50 = vrot.slane %v1294_v28, %v1636_v19 }
 0x1a2   :  { %v748_v24 = vmul.f32 %v1972_v39, %v723_v14  ;;  %v793_v59 = vpop.permute.xlu1 %792  ;;  %1291 = vmatmul.mubr.msk.f32.vlgmr.msra.gmra.mrb[2].mxu1 %vm421_vm6, %v338_v44  ;;  %v1338_v30 = vpack.c.bf16 %v789_v46, %v749_v62  ;;  %v819_v29 = vrot.slane %v1294_v28, %v1638_v23  ;;  %v811_v34 = vrot.slane %v1294_v28, %v1634_v18  ;;  %v997_v14 = vld [vmem:[%s1949_s6] sm:$0xff] }
 0x1a3   :  { %v1344_v26 = vpack.c.bf16 %v790_v33, %v750_v5  ;;  %1290 = vmatmul.mubr.msk.f32.vlgmr.msra.gmra.mrb[2].mxu0 %vm421_vm6, %v338_v44  ;;  %1343 = vmatprep.subr.bf16.mxu1 %v1342_v54  ;;  %v803_v52 = vsel %vm800_vm9, %v793_v59, %v795_v53 }
 0x1a4   :  { %v1340_v31 = vpack.c.bf16 %v788_v15, %v748_v24  ;;  %1339 = vmatprep.subr.bf16.mxu0 %v1338_v30  ;;  %901 = vmatprep.mubr.f32.mxu0 %v1968_v37  ;;  %v828_v56 = vmul.f32 %v811_v34, %v803_v52  ;;  %v1000_v15 = vld [vmem:[%s1949_s6 + $0x18] sm:$0xff]  ;;  %s1431_s6 = smov [#allocation5]  }
 0x1a5   :  { %1345 = vmatpush1.bf16.msra.mxu1 %v1344_v26  ;;  %v799_v35 = vpop.permute.xlu0 %798  ;;  %972 = vmatprep.mubr.f32.mxu1 %v1968_v37  ;;  %s1269_s0 = sshll.u32 %s1431_s6, 4  ;;  %s1270_s0 = int_to_ptr.vmem [resolvable:$true] %s1269_s0 }
 0x1a6   :  { %1341 = vmatpush1.bf16.msra.mxu0 %v1340_v31  ;;  %v797_v51 = vpop.permute.xlu1 %796  ;;  %v804_v41 = vsel %vm800_vm9, %v799_v35, %v793_v59  ;;  %s1392_s19 = scalar_lea.vmem %s1270_s0, 2048  ;;  %p1397_p9 = scmp.lt.s32.totalorder %s1270_s0, %s1270_s0 }
 0x1a7   :  { %v802_v49 = vsel %vm800_vm9, %v795_v53, %v797_v51  ;;  %v801_v19 = vsel %vm800_vm9, %v797_v51, %v799_v35  ;;  %v831_v18 = vmul.f32 %v823_v47, %v804_v41  ;;  %p1393_p8 = scmp.ne.s32.totalorder %s1270_s0, %s1392_s19  ;;  %p1398_p10 = scmp.lt.s32.totalorder %s1392_s19, %s1392_s19 }
 0x1a8   :  { %v829_v23 = vmul.f32 %v815_v50, %v802_v49  ;;  %v830_v0 = vmul.f32 %v819_v29, %v801_v19 }
 0x1a9   :  { %912 = vmatprep.subr.mxu1 %v831_v18  ;;  %p1399_p11 = por %p1398_p10, %p1397_p9 }
 0x1aa   :  { %841 = vmatprep.subr.mxu0 %v829_v23  ;;  %913 = vmatpush1.msra.mxu1 %v830_v0 }
 0x1ab   :  { %842 = vmatpush1.msra.mxu0 %v828_v56  ;;  %1297 = vmatmul.mubr.msk.f32.vlgmr.msra.gmra.mrb[2].mxu1 %vm421_vm6, %v1295_v17  ;;  %p1400_p12 = pnand %p1399_p11, %p1393_p8 }
 0x1ac   :  { %1296 = vmatmul.mubr.msk.f32.vlgmr.msra.gmra.mrb[2].mxu0 %vm421_vm6, %v1295_v17  ;;  %1191 = vmatprep.mubr.f32.mxu1 %v1968_v37 }
 0x1ad   :  { %1102 = vmatprep.mubr.f32.mxu0 %v1968_v37 }
 0x1b6   :  { %v1008_v38 = vpop.permute.xlu0 %1007 }
 0x1b7   :  { %v987_v48 = vpop.permute.xlu1 %986 }
 0x1bb   :  { %v1013_v39 = vpop.permute.xlu1 %1012 }
 0x27e   :  { %v974_v36 = vpop.f32.mrb[2].mxu1 }
 0x27f   :  { %v903_v42 = vpop.f32.mrb[2].mxu0  ;;  %v991_v58 = vadd.f32 %v987_v48, %v974_v36  ;;  %v976_v60 = vpop.f32.mrb[3].mxu1 }
 0x280   :  { %v989_v61 = vadd.f32 %v987_v48, %v903_v42  ;;  %v905_v27 = vpop.f32.mrb[3].mxu0  ;;  %v992_v45 = vadd.f32 %v987_v48, %v976_v60 }
 0x281   :  { %v990_v57 = vadd.f32 %v987_v48, %v905_v27  ;;  %v995_v40 = vmax.f32 %v991_v58, 0.0  ;;  %v1023_v58 = vpop.permute.xlu1 %1022 }
 0x282   :  { %v996_v21 = vmax.f32 %v992_v45, 0.0  ;;  %v993_v9 = vmax.f32 %v989_v61, 0.0 }
 0x283   :  { %v994_v10 = vmax.f32 %v990_v57, 0.0 }
 0x284   :  { %1127 = vmatprep.subr.mxu1 %v996_v21 }
 0x285   :  { %1038 = vmatprep.subr.mxu0 %v994_v10  ;;  %1128 = vmatpush1.msra.mxu1 %v995_v40 }
 0x286   :  { %1039 = vmatpush1.msra.mxu0 %v993_v9  ;;  %1302 = vmatmul.mubr.msk.f32.vlgmr.msra.gmra.mrb[4].mxu1 %vm1025_vm10, %v997_v14 }
 0x287   :  { %1298 = vmatmul.mubr.msk.f32.vlgmr.msra.gmra.mrb[4].mxu0 %vm1025_vm10, %v997_v14  ;;  %1197 = vmatprep.mubr.f32.mxu1 %v1968_v37 }
 0x288   :  { %1108 = vmatprep.mubr.f32.mxu0 %v1968_v37 }
 0x28a   :  { %1303 = vmatmul.mubr.msk.f32.gmra.mrb[6].mxu1 %vm1025_vm10, %v998_v25 }
 0x28b   :  { %1299 = vmatmul.mubr.msk.f32.gmra.mrb[6].mxu0 %vm1025_vm10, %v998_v25  ;;  %1203 = vmatprep.mubr.f32.mxu1 %v1968_v37 }
 0x28c   :  { %1114 = vmatprep.mubr.f32.mxu0 %v1968_v37 }
 0x28e   :  { %1304 = vmatmul.mubr.msk.f32.gmra.mrb[8].mxu1 %vm1025_vm10, %v999_v32 }
 0x28f   :  { %1300 = vmatmul.mubr.msk.f32.gmra.mrb[8].mxu0 %vm1025_vm10, %v999_v32  ;;  %1209 = vmatprep.mubr.f32.mxu1 %v1968_v37  ;;  %v1973_v32 = vld [vmem:[#allocation11_spill] sm:$0xff] }
 0x290   :  { %1120 = vmatprep.mubr.f32.mxu0 %v1968_v37 }
 0x292   :  { %1305 = vmatmul.mubr.msk.f32.gmra.mrb[10].mxu1 %vm1025_vm10, %v1000_v15 }
 0x293   :  { %1301 = vmatmul.mubr.msk.f32.gmra.mrb[10].mxu0 %vm1025_vm10, %v1000_v15 }
 0x359   :  { %v1193_v43 = vpop.f32.mrb[4].mxu1 }
 0x35a   :  { %v1104_v63 = vpop.f32.mrb[4].mxu0  ;;  %v1194_v44 = vadd.f32 %v1193_v43, %v1008_v38  ;;  %v1195_v55 = vpop.f32.mrb[5].mxu1  ;;  %v1975_v43 = vld [vmem:[#allocation9_spill] sm:$0xff] }
 0x35b   :  { %v1105_v62 = vadd.f32 %v1104_v63, %v1008_v38  ;;  %v1106_v1 = vpop.f32.mrb[5].mxu0  ;;  %v1196_v5 = vadd.f32 %v1195_v55, %v1008_v38 }
 0x35c   :  { %v1218_v46 = vadd.f32 %v1194_v44, %v1512_v11  ;;  %v1107_v33 = vadd.f32 %v1106_v1, %v1008_v38  ;;  %v1976_v44 = vld [vmem:[#allocation8_spill] sm:$0xff] }
 0x35d   :  { %v1216_v24 = vadd.f32 %v1105_v62, %v1504_v7  ;;  %v1219_v37 = vadd.f32 %v1196_v5, %v1498_v4  ;;  %v1199_v53 = vpop.f32.mrb[6].mxu1  ;;  %v1018_v7 = vpop.permute.xlu0 %1017 }
 0x35e   :  { %v1234_v54 = vmax.f32 %v1218_v46, 0.0  ;;  %v1217_v26 = vadd.f32 %v1107_v33, %v1494_v2  ;;  %v1110_v59 = vpop.f32.mrb[6].mxu0  ;;  %v1200_v28 = vadd.f32 %v1199_v53, %v1013_v39  ;;  %v1201_v30 = vpop.f32.mrb[7].mxu1 }
 0x35f   :  { %v1232_v31 = vmax.f32 %v1216_v24, 0.0  ;;  %v1235_v47 = vmax.f32 %v1219_v37, 0.0  ;;  %v1111_v50 = vadd.f32 %v1110_v59, %v1013_v39  ;;  %v1112_v29 = vpop.f32.mrb[7].mxu0  ;;  %v1202_v34 = vadd.f32 %v1201_v30, %v1013_v39 }
 0x360   :  { %1250 = vst [vmem:[#allocation5 + $0x10] sm:$0xff] %v1234_v54  ;;  %v1233_v11 = vmax.f32 %v1217_v26, 0.0  ;;  %v1222_v35 = vadd.f32 %v1200_v28, %v1514_v12  ;;  %v1113_v52 = vadd.f32 %v1112_v29, %v1013_v39 }
 0x361   :  { %1248 = vst [vmem:[#allocation5] sm:$0xff] %v1232_v31  ;;  %1251 = vst [vmem:[#allocation5 + $0x18] sm:$0xff] %v1235_v47  ;;  %v1220_v4 = vadd.f32 %v1111_v50, %v1506_v8  ;;  %v1223_v2 = vadd.f32 %v1202_v34, %v1502_v6  ;;  %v1205_v51 = vpop.f32.mrb[8].mxu1 }
 0x362   :  { %1249 = vst [vmem:[#allocation5 + $0x8] sm:$0xff] %v1233_v11  ;;  %v1238_v41 = vmax.f32 %v1222_v35, 0.0  ;;  %v1221_v49 = vadd.f32 %v1113_v52, %v1496_v3  ;;  %v1116_v19 = vpop.f32.mrb[8].mxu0  ;;  %v1206_v18 = vadd.f32 %v1205_v51, %v1018_v7  ;;  %v1207_v23 = vpop.f32.mrb[9].mxu1 }
 0x363   :  { %v1236_v0 = vmax.f32 %v1220_v4, 0.0  ;;  %v1239_v17 = vmax.f32 %v1223_v2, 0.0  ;;  %v1117_v56 = vadd.f32 %v1116_v19, %v1018_v7  ;;  %v1118_v12 = vpop.f32.mrb[9].mxu0  ;;  %v1208_v48 = vadd.f32 %v1207_v23, %v1018_v7 }
 0x364   :  { %1254 = vst [vmem:[#allocation5 + $0x30] sm:$0xff] %v1238_v41  ;;  %v1237_v36 = vmax.f32 %v1221_v49, 0.0  ;;  %v1226_v42 = vadd.f32 %v1206_v18, %v1534_v22  ;;  %v1119_v8 = vadd.f32 %v1118_v12, %v1018_v7 }
 0x365   :  { %1252 = vst [vmem:[#allocation5 + $0x20] sm:$0xff] %v1236_v0  ;;  %1255 = vst [vmem:[#allocation5 + $0x38] sm:$0xff] %v1239_v17  ;;  %v1224_v6 = vadd.f32 %v1117_v56, %v1530_v20  ;;  %v1227_v3 = vadd.f32 %v1208_v48, %v1522_v16  ;;  %v1211_v60 = vpop.f32.mrb[10].mxu1  ;;  %v1974_v16 = vld [vmem:[#allocation10_spill] sm:$0xff] }
 0x366   :  { %1253 = vst [vmem:[#allocation5 + $0x28] sm:$0xff] %v1237_v36  ;;  %v1242_v61 = vmax.f32 %v1226_v42, 0.0  ;;  %v1225_v27 = vadd.f32 %v1119_v8, %v1516_v13  ;;  %v1122_v45 = vpop.f32.mrb[10].mxu0  ;;  %v1212_v57 = vadd.f32 %v1211_v60, %v1023_v58  ;;  %v1213_v21 = vpop.f32.mrb[11].mxu1 }
 0x367   :  { %v1240_v40 = vmax.f32 %v1224_v6, 0.0  ;;  %v1243_v10 = vmax.f32 %v1227_v3, 0.0  ;;  %v1123_v14 = vadd.f32 %v1122_v45, %v1023_v58  ;;  %v1124_v22 = vpop.f32.mrb[11].mxu0  ;;  %v1214_v9 = vadd.f32 %v1213_v21, %v1023_v58 }
 0x368   :  { %1258 = vst [vmem:[#allocation5 + $0x50] sm:$0xff] %v1242_v61  ;;  %v1241_v25 = vmax.f32 %v1225_v27, 0.0  ;;  %v1230_v15 = vadd.f32 %v1212_v57, %v1973_v32  ;;  %v1125_v20 = vadd.f32 %v1124_v22, %v1023_v58 }
 0x369   :  { %1256 = vst [vmem:[#allocation5 + $0x40] sm:$0xff] %v1240_v40  ;;  %1259 = vst [vmem:[#allocation5 + $0x58] sm:$0xff] %v1243_v10  ;;  %v1228_v38 = vadd.f32 %v1123_v14, %v1974_v16  ;;  %v1231_v63 = vadd.f32 %v1214_v9, %v1975_v43 }
 0x36a   :  { %1257 = vst [vmem:[#allocation5 + $0x48] sm:$0xff] %v1241_v25  ;;  %v1246_v13 = vmax.f32 %v1230_v15, 0.0  ;;  %v1229_v55 = vadd.f32 %v1125_v20, %v1976_v44 }
 0x36b   :  { %v1244_v62 = vmax.f32 %v1228_v38, 0.0  ;;  %v1247_v1 = vmax.f32 %v1231_v63, 0.0 }
 0x36c   :  { %1262 = vst [vmem:[#allocation5 + $0x70] sm:$0xff] %v1246_v13  ;;  %v1245_v5 = vmax.f32 %v1229_v55, 0.0 }
 0x36d   :  { %1260 = vst [vmem:[#allocation5 + $0x60] sm:$0xff] %v1244_v62  ;;  %1263 = vst [vmem:[#allocation5 + $0x78] sm:$0xff] %v1247_v1 }
 0x36e   :  { %1261 = vst [vmem:[#allocation5 + $0x68] sm:$0xff] %v1245_v5 }
 0x36f   :  { %1403 = shalt.err (!%p1400_p12)
}
 0x370   :  { %s1404_s2 = scalar_lea.hbm %s1951_s8, 2048 }
 0x371   :  { %p1405_p13 = scmp.ne.s32.totalorder %s1951_s8, %s1404_s2  ;;  %p1408_p0 = scmp.lt.u32.totalorder %s1404_s2, %s1951_s8 }
 0x373   :  { %p1410_p1 = pnand %p1408_p0, %p1405_p13 }
 0x375   :  { %1413 = shalt.err (!%p1410_p1)
}
 0x376   :  { %1275 = dma.vmem_to_hbm [thread:$0]  %s1270_s0, 2048, %s1951_s8, [#allocation4], %s1419_s15, %s1419_s15, %s1420_s16  }
 0x377   :  { %1416 = dma.done.wait [#allocation4], 2048  }
 0x378   :  { %1417 = vsyncadd [#allocation4], 4294965248 }
 0x379   :  { %1279 = vsyncpa [#allocation3], 1 }
 0x37a   :  { %1280 = vsyncpa [#allocation4], 1 }

</bundles_post_ra>
